<compile_context>
chip_gen: v7x
topology: tpu7x:2x2x1
jax: 0.10.0
libtpu: 0.0.40
codegen_flags: <defaults>
</compile_context>

<pallas_src>
import functools
import math

import numpy as np
import jax
import jax.numpy as jnp
from jax.experimental import pallas as pl
from jax.experimental.pallas import tpu as pltpu


def _pe_kernel(a_ref, c_ref, o_ref, *, r_tile, q, d, zeros_pad, scale):
    """a_ref, c_ref: (1, L) f32 lane tables; o_ref: (1, r_tile, L) output block.

    Flat-layout element (r, l) of row-tile j holds position
        t = (j*r_tile + r)*q + l//d   and feature   i = l % d.
    angle = t*inv_freq[i] + phase[i] is rewritten as t_base*a[l] + c[l] with
        a[l] = inv_freq[l % d],  c[l] = (l // d)*a[l] + phase[l % d],
    so the kernel needs a single fused mul-add and one sin per element.
    """
    j = pl.program_id(1)
    r_idx = jax.lax.broadcasted_iota(jnp.int32, (r_tile, 1), 0)
    t_base = ((r_idx + j * r_tile) * q).astype(jnp.float32)        # (r_tile, 1)
    val = jnp.sin(t_base * a_ref[...] + c_ref[...])                # (r_tile, L)
    if scale:
        val = val * jnp.float32(d ** 0.5)
    o_ref[0, :, :] = val.astype(o_ref.dtype)

    if zeros_pad:
        @pl.when(j == 0)
        def _():
            # Position id t == 0 lives only in lanes [0, d) of row 0 of tile 0.
            o_ref[0, 0:1, 0:d] = jnp.zeros((1, d), o_ref.dtype)


def positional_encoding(inputs, num_units, zeros_pad=True, scale=True, *,
                        max_block_bytes=4 * 1024 * 1024):
    """inputs: (N, T, ...) array; only N, T are used (as in the PyTorch module)."""
    N, T = int(inputs.shape[0]), int(inputs.shape[1])
    D = int(num_units)

    # Group q consecutive positions per output row so the lane width L = q*D is
    # a multiple of 128 (lane-dense, unmasked stores). Fall back to q = 1
    # (plain (T, D) rows, possibly masked tail) if T does not cooperate.
    q = 128 // math.gcd(D, 128)
    if T % q != 0:
        q = 1
    while q * D < 512 and T % (2 * q) == 0:
        q *= 2
    L = q * D
    P = T // q                                  # flat rows per batch element

    # Host-precomputed per-lane tables (single-sin phase trick; no in-kernel exp).
    lane = np.arange(L)
    col = lane % D
    inv_freq = np.power(10000.0, -2.0 * col / D).astype(np.float32)
    phase = np.where(col % 2 == 0, 0.0, np.pi / 2.0).astype(np.float32)
    a_lane = inv_freq.reshape(1, L)
    c_lane = ((lane // D).astype(np.float32) * inv_freq + phase).reshape(1, L)

    # Rows per block: big enough to amortize per-step overhead (~0.35us), small
    # enough that the double-buffered output block + temps fit VMEM everywhere.
    if P <= 8:
        r_tile = P
    else:
        budget_rows = max(8, (max_block_bytes // (L * 4)) // 8 * 8)
        r_tile = max(8, min((P // 8) * 8, budget_rows))
        if N == 1:
            # keep >= 2 row tiles so a second TensorCore has work
            half = -(-P // 2)
            r_tile = min(r_tile, max(8, -(-half // 8) * 8))
    num_row_tiles = -(-P // r_tile)

    kernel = functools.partial(
        _pe_kernel, r_tile=r_tile, q=q, d=D,
        zeros_pad=bool(zeros_pad), scale=bool(scale),
    )

    flat = pl.pallas_call(
        kernel,
        out_shape=jax.ShapeDtypeStruct((N, P, L), jnp.float32),
        grid=(N, num_row_tiles),
        in_specs=[
            pl.BlockSpec((1, L), lambda n, j: (0, 0)),
            pl.BlockSpec((1, L), lambda n, j: (0, 0)),
        ],
        out_specs=pl.BlockSpec((1, r_tile, L), lambda n, j: (n, j, 0)),
        compiler_params=pltpu.CompilerParams(
            dimension_semantics=("parallel", "parallel"),
            vmem_limit_bytes=32 * 1024 * 1024,
        ),
    )(jnp.asarray(a_lane), jnp.asarray(c_lane))

    # Free, contiguous reshape back to the PyTorch-facing layout.
    return flat.reshape(N, T, D)


def _reference(inputs, num_units, zeros_pad=True, scale=True):
    """Pure-JAX reference mirroring the PyTorch forward."""
    N, T = inputs.shape[0], inputs.shape[1]
    pos = jnp.arange(T, dtype=jnp.float32)[:, None]
    i = jnp.arange(num_units, dtype=jnp.float32)[None, :]
    enc = pos / jnp.power(10000.0, 2.0 * i / num_units)
    table = jnp.where((jnp.arange(num_units) % 2 == 0)[None, :],
                      jnp.sin(enc), jnp.cos(enc))
    if zeros_pad:
        table = table.at[0].set(0.0)
    out = jnp.broadcast_to(table[None], (N, T, num_units))
    if scale:
        out = out * num_units ** 0.5
    return out


if __name__ == "__main__":
    key = jax.random.PRNGKey(0)
    N, T, num_units = 2, 16, 32
    # token-id style input; values are irrelevant, only the shape is used
    x = jax.random.randint(key, (N, T), 0, 100, dtype=jnp.int32)

    out = positional_encoding(x, num_units, zeros_pad=True, scale=True)
    out = jax.block_until_ready(out)

    ref = _reference(x, num_units, zeros_pad=True, scale=True)
    assert out.shape == (N, T, num_units)
    assert jnp.allclose(out, ref, atol=1e-4, rtol=1e-4), "mismatch vs reference"

    print("KERNEL_OK")
</pallas_src>

<mosaic_0001>
module attributes {stable_mosaic.version = 11 : i64} {
  func.func @_pe_kernel(%arg0: i32, %arg1: i32, %arg2: memref<1x512xf32, #tpu.memory_space<vmem>>, %arg3: memref<1x512xf32, #tpu.memory_space<vmem>>, %arg4: memref<1x1x512xf32, #tpu.memory_space<vmem>>) attributes {dimension_semantics = [#tpu.dimension_semantics<parallel>, #tpu.dimension_semantics<parallel>], iteration_bounds = array<i64: 2, 1>, scalar_prefetch = 0 : i64, scratch_operands = 0 : i64, tpu.core_type = #tpu.core_type<tc>, window_params = [{pipeline_mode = #tpu.pipeline_mode<synchronous>, transform_indices = @transform_0, window_bounds = array<i64: 1, 512>}, {pipeline_mode = #tpu.pipeline_mode<synchronous>, transform_indices = @transform_1, window_bounds = array<i64: 1, 512>}, {transform_indices = @transform_2, window_bounds = array<i64: 1, 1, 512>}]} {
    %0 = tpu.iota {dimensions = array<i32: 0>} : vector<1x1xi32>
    %c1_i32 = arith.constant 1 : i32
    %1 = arith.muli %arg1, %c1_i32 : i32
    %2 = vector.broadcast %1 : i32 to vector<1x1xi32>
    %3 = arith.addi %0, %2 : vector<1x1xi32>
    %c16_i32 = arith.constant 16 : i32
    %4 = vector.broadcast %c16_i32 : i32 to vector<1x1xi32>
    %5 = arith.muli %3, %4 : vector<1x1xi32>
    %6 = arith.sitofp %5 : vector<1x1xi32> to vector<1x1xf32>
    %c0 = arith.constant 0 : index
    %c0_0 = arith.constant 0 : index
    %7 = vector.load %arg2[%c0, %c0_0] : memref<1x512xf32, #tpu.memory_space<vmem>>, vector<1x512xf32>
    %8 = vector.broadcast %6 : vector<1x1xf32> to vector<1x512xf32>
    %9 = arith.mulf %8, %7 : vector<1x512xf32>
    %c0_1 = arith.constant 0 : index
    %c0_2 = arith.constant 0 : index
    %10 = vector.load %arg3[%c0_1, %c0_2] : memref<1x512xf32, #tpu.memory_space<vmem>>, vector<1x512xf32>
    %11 = arith.addf %9, %10 : vector<1x512xf32>
    %12 = math.sin %11 : vector<1x512xf32>
    %cst = arith.constant 5.65685415 : f32
    %13 = vector.broadcast %cst : f32 to vector<1x512xf32>
    %14 = arith.mulf %12, %13 : vector<1x512xf32>
    %c0_3 = arith.constant 0 : index
    %c0_4 = arith.constant 0 : index
    %c0_5 = arith.constant 0 : index
    %15 = vector.load %arg4[%c0_3, %c0_4, %c0_5] : memref<1x1x512xf32, #tpu.memory_space<vmem>>, vector<1x1x512xf32>
    %16 = vector.shape_cast %15 : vector<1x1x512xf32> to vector<1x512xf32>
    %17 = vector.shape_cast %14 : vector<1x512xf32> to vector<1x1x512xf32>
    tpu.vector_store %arg4[%c0_3, %c0_4, %c0_5], %17 {strides = array<i32>} : memref<1x1x512xf32, #tpu.memory_space<vmem>>, vector<1x1x512xf32>,
    %c0_i32 = arith.constant 0 : i32
    %18 = arith.cmpi eq, %arg1, %c0_i32 : i32
    %19 = arith.extui %18 : i1 to i32
    %c0_i32_6 = arith.constant 0 : i32
    %20 = arith.cmpi ne, %19, %c0_i32_6 : i32
    scf.if %20 {
      %cst_7 = arith.constant 0.000000e+00 : f32
      %21 = vector.broadcast %cst_7 : f32 to vector<1x32xf32>
      %c0_8 = arith.constant 0 : index
      %c0_9 = arith.constant 0 : index
      %c0_10 = arith.constant 0 : index
      %22 = vector.load %arg4[%c0_8, %c0_9, %c0_10] : memref<1x1x512xf32, #tpu.memory_space<vmem>>, vector<1x1x32xf32>
      %23 = vector.shape_cast %22 : vector<1x1x32xf32> to vector<1x32xf32>
      %24 = vector.shape_cast %21 : vector<1x32xf32> to vector<1x1x32xf32>
      tpu.vector_store %arg4[%c0_8, %c0_9, %c0_10], %24 {strides = array<i32>} : memref<1x1x512xf32, #tpu.memory_space<vmem>>, vector<1x1x32xf32>,
    } else {
    }
    return
  }
  func.func @transform_0(%arg0: i32, %arg1: i32) -> (i32, i32) {
    %c0_i32 = arith.constant 0 : i32
    %c0_i32_0 = arith.constant 0 : i32
    %c0_i32_1 = arith.constant 0 : i32
    return %c0_i32, %c0_i32_0 : i32, i32
  }
  func.func @transform_1(%arg0: i32, %arg1: i32) -> (i32, i32) {
    %c0_i32 = arith.constant 0 : i32
    %c0_i32_0 = arith.constant 0 : i32
    %c0_i32_1 = arith.constant 0 : i32
    return %c0_i32, %c0_i32_0 : i32, i32
  }
  func.func @transform_2(%arg0: i32, %arg1: i32) -> (i32, i32, i32) {
    %c0_i32 = arith.constant 0 : i32
    %c0_i32_0 = arith.constant 0 : i32
    return %arg0, %arg1, %c0_i32 : i32, i32, i32
  }
}

</mosaic_0001>

<bundles_post_ra>
// kernel: tpu_custom_call.1
= control target key start
LH: loop header
LB: loop body
LE: loop exit
PB: predicated region body
PF: predicated region fallthrough
CT: control target
= control target key end

     0   :  { %7 = vsyncpa [#allocation3], 0  ;;  %s1567_s0 = inlined_call_operand.hbm [shape: f32[1,512], index: 0, kind: input, shape index: {}]   ;;  %s1568_s1 = inlined_call_operand.hbm [shape: f32[1,512], index: 1, kind: input, shape index: {}]   ;;  %s1569_s2 = inlined_call_operand.hbm [shape: f32[2,1,512], index: 2, kind: output, shape index: {}]  }
   0x1   :  { %8 = vsyncpa [#allocation6], 0 }
   0x2   :  { %9 = vsyncpa [#allocation4], 0 }
   0x3   :  { %11 = vsyncpa [#allocation4 + $0x1], 0  ;;  %s1095_s9 = smov 0   ;;  %s1097_s10 = smov 0  }
   0x4   :  { %s1099_s11 = smov 0   ;;  %s1101_s12 = smov 0  }
   0x5   :  { %s1103_s13 = smov 0   ;;  %s1105_s14 = smov 0  }
   0x6 LB: > { %s778_s15 = sadd.s32 4294967295, %s1067_s14   ;;  %s779_s16 = sadd.s32 4294967294, %s1067_s14   ;;  %s1067_s14 = sphi %s1105_s14, %s17_s14   ;;  %s1063_s13 = sphi %s1103_s13, %s1595_s13   ;;  %s1059_s12 = sphi %s1101_s12, %s1594_s12   ;;  %s1055_s11 = sphi %s1099_s11, %s1593_s11   ;;  %s1051_s10 = sphi %s1097_s10, %s1592_s10   ;;  %s1047_s9 = sphi %s1095_s9, %s1591_s9  }
   0x7   : > { %s29_s17 = sadd.s32 1, %s1063_s13  ;;  %s80_s18 = sadd.s32 1, %s1055_s11 }
   0x8   : > { %p31_p0 = scmp.ge.s32.totalorder %s29_s17, 2  ;;  %p90_p1 = scmp.ne.s32.totalorder %s1055_s11, %s1051_s10 }
   0x9   : > { %p91_p2 = scmp.eq.s32.totalorder %s778_s15, 1  ;;  %p96_p3 = scmp.ne.s32.totalorder %s1051_s10, %s1047_s9 }
   0xa   : > { %s1597_s17 = smov (%p31_p0, %s29_s17), 0  ;;  %p97_p5 = scmp.eq.s32.totalorder %s779_s16, 1 }
   0xb   : > { %p1135_p4 = por %p91_p2, %p90_p1  ;;  %s75_s20 = ssub.s32 %s1063_s13, %s1597_s17 }
   0xc   : > { %p780_p6 = scmp.ge.s32.totalorder %s1067_s14, 1  ;;  %p78_p7 = scmp.eq.s32.totalorder %s75_s20, 0 }
   0xd   : > { %s1574_s19 = scalar_select %p1135_p4, 1, 0 }
   0xe   : > { %p1142_p8 = por %p97_p5, %p96_p3  ;;  %p104_p9 = scmp.lt.s32.totalorder %s1067_s14, 3 }
   0xf   : > { %s1148_s22 = scalar_select %p78_p7, %s1055_s11, %s80_s18  }
  0x10   : > { %s1575_s21 = scalar_select %p1142_p8, 1, 0 }
  0x11   : > { %p1150_p10 = pnand %p780_p6, %p104_p9  ;;  %p1154_p11 = scmp.eq.s32.totalorder %s778_s15, 0 }
  0x12   : > { %s1069_s25 = smov [#allocation2]   ;;  %s1070_s27 = smov [#allocation5]  }
  0x13   : > { %s1576_s23 = scalar_select %p1150_p10, 1, 0 }
  0x14   : > { %s1577_s24 = scalar_select %p1154_p11, 1, 0 }
  0x15   : > { %p835_p12 = pneg %p1150_p10  ;;  %s117_s26 = sshll.u32 %s1069_s25, 4  ;;  %s118_s26 = int_to_ptr.vmem [resolvable:$true] %s117_s26 }
  0x16   : > { %s128_s28 = sshll.u32 %s1070_s27, 4  ;;  %s925_s4 = scalar_lea.hbm %s1567_s0, 64  ;;  %s1166_s28 = int_to_ptr.vmem [resolvable:$true] %s128_s28 }
  0x17   : > { %p1162_p13 = pnand %p1154_p11, %p835_p12  ;;  %p926_p0 = scmp.ne.s32.totalorder %s1567_s0, %s925_s4 }
  0x18   : > { %p932_p5 = scmp.lt.u32.totalorder %s925_s4, %s1567_s0 }
  0x19   : > { %p927_p1 = pneg %p1162_p13 }
  0x1b   : > { %p928_p2 = pnand %p927_p1, %p926_p0 }
  0x1d   : > { %p929_p3 = pneg %p928_p2 }
  0x1f   : > { %p934_p6 = pnand %p932_p5, %p929_p3 }
  0x21   : > { %937 = shalt.err (!%p934_p6)
}
  0x22   : > { %s938_s15 = scalar_lea.vmem %s118_s26, 64  ;;  %p946_p8 = scmp.lt.s32.totalorder %s118_s26, %s118_s26 }
  0x23   : > { %p939_p7 = scmp.ne.s32.totalorder %s118_s26, %s938_s15  ;;  %p947_p4 = scmp.lt.s32.totalorder %s938_s15, %s938_s15 }
  0x25   : > { %p941_p9 = pnand %p939_p7, %p927_p1  ;;  %p948_p11 = por %p947_p4, %p946_p8 }
  0x27   : > { %p942_p12 = pneg %p941_p9 }
  0x29   : > { %p949_p10 = pnand %p948_p11, %p942_p12 }
  0x2b   : > { %952 = shalt.err (!%p949_p10)
}
  0x2c   : > { %838 = dma.hbm_to_vmem [thread:$0]  (!%p1162_p13), %s1567_s0, 64, %s118_s26, [#allocation3]  }
  0x2d   : > { %s953_s27 = scalar_lea.hbm %s1568_s1, 64 }
  0x2e   : > { %p954_p0 = scmp.ne.s32.totalorder %s1568_s1, %s953_s27  ;;  %p960_p10 = scmp.lt.u32.totalorder %s953_s27, %s1568_s1 }
  0x30   : > { %p956_p4 = pnand %p954_p0, %p927_p1 }
  0x32   : > { %p957_p8 = pneg %p956_p4 }
  0x34   : > { %p962_p11 = pnand %p960_p10, %p957_p8 }
  0x36   : > { %965 = shalt.err (!%p962_p11)
}
  0x37   : > { %s966_s26 = scalar_lea.vmem %s1166_s28, 64  ;;  %p974_p6 = scmp.lt.s32.totalorder %s1166_s28, %s1166_s28 }
  0x38   : > { %p967_p2 = scmp.ne.s32.totalorder %s1166_s28, %s966_s26  ;;  %p975_p7 = scmp.lt.s32.totalorder %s966_s26, %s966_s26 }
  0x3a   : > { %p969_p3 = pnand %p967_p2, %p927_p1  ;;  %p976_p9 = por %p975_p7, %p974_p6 }
  0x3c   : > { %p970_p5 = pneg %p969_p3 }
  0x3e   : > { %p977_p12 = pnand %p976_p9, %p970_p5 }
  0x40   : > { %980 = shalt.err (!%p977_p12)
}
  0x41   : > { %841 = dma.hbm_to_vmem [thread:$0]  (!%p1162_p13), %s1568_s1, 64, %s1166_s28, [#allocation6]  }
  0x42   : > { %p1579_p0 = scmp.ne.s32.totalorder %s1576_s23, 0 }
  0x43   : > { %p1580_p4 = scmp.ne.s32.totalorder (!%p1579_p0), %s1577_s24, 0 }
  0x44   : > { %141 = sbr.rel (%p1579_p0) target bundleno = 240 (0xf0), region = 28 }
  0x4b   : > { %1034 = dma.done.wait (%p1580_p4), [#allocation3], 64  }
  0x4c   : > { %1036 = vsyncadd (%p1580_p4), [#allocation3], 4294967232 }
  0x4d   : > { %1038 = dma.done.wait (%p1580_p4), [#allocation6], 64  }
  0x4e   : > { %1040 = vsyncadd (%p1580_p4), [#allocation6], 4294967232  ;;  %v162_v0 = vlaneseq  ;;  %v168_v7 = vld [vmem:[#allocation2] sm:$0xf]  ;;  %v194_v8 = vld [vmem:[#allocation5] sm:$0xf] }
  0x4f   : > { %v1071_v51 = vmov 683565275   ;;  %v1072_v53 = vmov 2475754826   ;;  %v1073_v55 = vmov 2131351028  }
  0x50   : > { %v1226_v1 = vshrl.u32 %v162_v0, 7  ;;  %v1074_v57 = vmov 2102212464   ;;  %v1075_v59 = vmov 920167782   ;;  %s159_s23 = sand.u32 1, %s1051_s10  }
  0x51   : > { %s786_s24 = sshll.u32 %s159_s23, 2  ;;  %s808_s28 = sshll.u32 %s1059_s12, 6 }
  0x52   : > { %v166_v2 = vmul.u32 16, %v1226_v1  ;;  %v172_v3 = vsub.s32 0, %v1226_v1  ;;  %v176_v4 = vsub.s32 1, %v1226_v1  ;;  %v180_v5 = vsub.s32 2, %v1226_v1  ;;  %s161_s29 = scalar_lea.vmem [#allocation7], %s786_s24  ;;  %s1520_s18 = scalar_lea.hbm %s1569_s2, %s808_s28 }
  0x53   : > { %v184_v25 = vsub.s32 3, %v1226_v1  ;;  %s698_s8 = sshll.u32 %s161_s29, 4  ;;  %s682_s12 = scalar_lea.sflag [#allocation4], %s159_s23  ;;  %s1522_s8 = int_to_ptr.vmem [resolvable:$true] %s698_s8 }
  0x54   : > { %v167_v6 = vcvt.s32.f32 %v166_v2  ;;  %v173_v9 = vrot.slane %v168_v7, %v172_v3  ;;  %v177_v10 = vrot.slane %v168_v7, %v176_v4  ;;  %v181_v11 = vrot.slane %v168_v7, %v180_v5  ;;  %s981_s20 = scalar_lea.vmem %s1522_s8, 64  ;;  %p1589_p1 = scmp.ne.s32.totalorder %s1574_s19, 0 }
  0x55   : > { %v199_v12 = vrot.slane %v194_v8, %v172_v3  ;;  %v203_v13 = vrot.slane %v194_v8, %v176_v4  ;;  %v207_v14 = vrot.slane %v194_v8, %v180_v5  ;;  %v185_v34 = vrot.slane %v168_v7, %v184_v25  ;;  %p982_p13 = scmp.ne.s32.totalorder %s1522_s8, %s981_s20  ;;  %s1079_s25 = smov [#allocation7]  }
  0x56   : > { %v190_v15 = vmul.f32 %v173_v9, %v167_v6  ;;  %v191_v16 = vmul.f32 %v177_v10, %v167_v6  ;;  %v192_v17 = vmul.f32 %v181_v11, %v167_v6  ;;  %v1248_v40 = vrot.slane %v194_v8, %v184_v25  ;;  %s985_s27 = sshll.u32 %s1079_s25, 4  ;;  %s986_s27 = int_to_ptr.vmem [resolvable:$false] %s985_s27 }
  0x57   : > { %v1250_v42 = vmul.f32 %v185_v34, %v167_v6  ;;  %v1076_v5 = vmov 1326507024   ;;  %p983_p8 = pnand %p982_p13, %p1589_p1  ;;  %s987_s30 = scalar_lea.vmem %s986_s27, 128 }
  0x58   : > { %v1232_v18 = vadd.f32 %v199_v12, %v190_v15  ;;  %v1234_v19 = vadd.f32 %v203_v13, %v191_v16  ;;  %v1236_v20 = vadd.f32 %v207_v14, %v192_v17  ;;  %p988_p11 = scmp.lt.s32.totalorder %s1522_s8, %s986_s27  ;;  %p989_p2 = scmp.lt.s32.totalorder %s987_s30, %s981_s20 }
  0x59   : > { %p984_p10 = pneg %p983_p8 }
  0x5a   : > { %v220_v21 = vand.u32 2147483647, %v1232_v18  ;;  %v223_v22 = vand.u32 2139095040, %v1232_v18  ;;  %v324_v23 = vand.u32 2147483647, %v1234_v19  ;;  %v327_v24 = vand.u32 2139095040, %v1234_v19  ;;  %p990_p3 = por %p989_p2, %p988_p11 }
  0x5b   : > { %v431_v30 = vand.u32 2139095040, %v1236_v20 }
  0x5c   : > { %v224_v26 = vshrl.u32 %v223_v22, 23  ;;  %v227_v27 = vand.u32 8388607, %v220_v21  ;;  %v328_v28 = vshrl.u32 %v327_v24, 23  ;;  %v331_v29 = vand.u32 8388607, %v324_v23  ;;  %p991_p5 = pnand %p990_p3, %p984_p10 }
  0x5d   : > { %v432_v33 = vshrl.u32 %v431_v30, 23 }
  0x5e   : > { %v787_v31 = vadd.s32 4294967169, %v224_v26  ;;  %v791_v32 = vadd.s32 4294967169, %v328_v28  ;;  %v228_v36 = vor.u32 8388608, %v227_v27  ;;  %v332_v37 = vor.u32 8388608, %v331_v29 }
  0x5f   : > { %v795_v39 = vadd.s32 4294967169, %v432_v33 }
  0x60   : > { %v230_v35 = vadd.s32 1, %v787_v31  ;;  %v334_v38 = vadd.s32 1, %v791_v32  ;;  %v1252_v46 = vshll.u32 %v228_v36, 8  ;;  %v1254_v48 = vshll.u32 %v332_v37, 8 }
  0x61   : > { %v1256_v49 = vadd.s32 1, %v795_v39 }
  0x62   : > { %vm231_vm0 = vcmp.gt.s32.totalorder %v230_v35, 0  ;;  %vm335_vm1 = vcmp.gt.s32.totalorder %v334_v38, 0 }
  0x63   : > { %v232_v41 = vsel %vm231_vm0, %v230_v35, 0  ;;  %v336_v45 = vsel %vm335_vm1, %v334_v38, 0  ;;  %vm439_vm6 = vcmp.gt.s32.totalorder %v1256_v49, 0 }
  0x64   : > { %v233_v43 = vshrl.u32 %v232_v41, 5  ;;  %v234_v44 = vand.u32 31, %v232_v41  ;;  %v338_v47 = vand.u32 31, %v336_v45  ;;  %v1263_v61 = vshrl.u32 %v336_v45, 5 }
  0x66   : > { %v235_v50 = vsub.s32 32, %v234_v44  ;;  %v237_v52 = vshll.u32 %v1071_v51, %v234_v44  ;;  %v240_v54 = vshll.u32 %v1072_v53, %v234_v44  ;;  %v243_v56 = vshll.u32 %v1073_v55, %v234_v44 }
  0x67   : > { %v246_v58 = vshll.u32 %v1074_v57, %v234_v44  ;;  %v249_v60 = vshll.u32 %v1075_v59, %v234_v44  ;;  %vm252_vm2 = vcmp.lt.s32.totalorder %v233_v43, 1  ;;  %vm253_vm3 = vcmp.lt.s32.totalorder %v233_v43, 2 }
  0x68   : > { %v236_v62 = vshrl.u32 %v1071_v51, %v235_v50  ;;  %v238_v63 = vshrl.u32 %v1072_v53, %v235_v50  ;;  %v241_v2 = vshrl.u32 %v1073_v55, %v235_v50  ;;  %v244_v3 = vshrl.u32 %v1074_v57, %v235_v50 }
  0x69   : > { %v247_v4 = vshrl.u32 %v1075_v59, %v235_v50  ;;  %v250_v6 = vshrl.u32 %v1076_v5, %v235_v50  ;;  %vm255_vm4 = vcmp.lt.s32.totalorder %v233_v43, 4  ;;  %v339_v10 = vsub.s32 32, %v338_v47 }
  0x6a   : > { %v239_v7 = vor.u32 %v238_v63, %v237_v52  ;;  %v242_v8 = vor.u32 %v241_v2, %v240_v54  ;;  %v245_v9 = vor.u32 %v244_v3, %v243_v56  ;;  %vm254_vm5 = vcmp.lt.s32.totalorder %v233_v43, 3 }
  0x6b   : > { %v248_v11 = vor.u32 %v247_v4, %v246_v58  ;;  %v251_v12 = vor.u32 %v250_v6, %v249_v60  ;;  %v341_v13 = vshll.u32 %v1071_v51, %v338_v47  ;;  %v344_v26 = vshll.u32 %v1072_v53, %v338_v47 }
  0x6c   : > { %v256_v14 = vsel %vm252_vm2, %v236_v62, %v239_v7  ;;  %v257_v15 = vsel %vm255_vm4, %v245_v9, 2102212464  ;;  %v260_v16 = vsel %vm252_vm2, %v239_v7, %v242_v8  ;;  %v264_v17 = vsel %vm252_vm2, %v242_v8, %v245_v9 }
  0x6d   : > { %v258_v22 = vsel %vm254_vm5, %v242_v8, %v257_v15  ;;  %v261_v24 = vsel %vm255_vm4, %v248_v11, 920167782  ;;  %v265_v25 = vsel %vm255_vm4, %v251_v12, 1326507024  ;;  %v340_v29 = vshrl.u32 %v1071_v51, %v339_v10 }
  0x6e   : > { %v262_v27 = vsel %vm254_vm5, %v245_v9, %v261_v24  ;;  %v266_v28 = vsel %vm254_vm5, %v248_v11, %v265_v25  ;;  %v342_v30 = vshrl.u32 %v1072_v53, %v339_v10  ;;  %v259_v31 = vsel %vm253_vm3, %v256_v14, %v258_v22 }
  0x6f   : > { %v263_v32 = vsel %vm253_vm3, %v260_v16, %v262_v27  ;;  %v267_v33 = vsel %vm253_vm3, %v264_v17, %v266_v28  ;;  %v345_v34 = vshrl.u32 %v1073_v55, %v339_v10  ;;  %v347_v44 = vshll.u32 %v1073_v55, %v338_v47 }
  0x70   : > { %v1284_v35 = vmul.u32.u64.low %v1252_v46, %v267_v33  ;;  %v1285_v36 = vmul.u32.u64.high %v1252_v46, %v267_v33, %v1284_v35  ;;  %v1288_v37 = vmul.u32.u64.low %v1252_v46, %v263_v32  ;;  %v1289_v38 = vmul.u32.u64.high %v1252_v46, %v263_v32, %v1288_v37 }
  0x71   : > { %v343_v39 = vor.u32 %v342_v30, %v341_v13  ;;  %v346_v41 = vor.u32 %v345_v34, %v344_v26  ;;  %v348_v45 = vshrl.u32 %v1074_v57, %v339_v10  ;;  %v350_v43 = vshll.u32 %v1074_v57, %v338_v47 }
  0x72   : > { %v351_v50 = vshrl.u32 %v1075_v59, %v339_v10  ;;  %v353_v52 = vshll.u32 %v1075_v59, %v338_v47  ;;  %v354_v54 = vshrl.u32 %v1076_v5, %v339_v10  ;;  %v275_v56 = vmul.u32 %v1252_v46, %v259_v31 }
  0x73   : > { %v349_v58 = vor.u32 %v348_v45, %v347_v44  ;;  %vm356_vm7 = vcmp.lt.s32.totalorder %v1263_v61, 1  ;;  %vm357_vm8 = vcmp.lt.s32.totalorder %v1263_v61, 2  ;;  %vm277_vm9 = vc.u32 %v1285_v36, %v1288_v37 }
  0x74   : > { %v278_v60 = vadd.s32 1, %v1289_v38  ;;  %v352_v62 = vor.u32 %v351_v50, %v350_v43  ;;  %vm358_vm10 = vcmp.lt.s32.totalorder %v1263_v61, 3  ;;  %v355_v63 = vor.u32 %v354_v54, %v353_v52 }
  0x75   : > { %vm359_vm11 = vcmp.lt.s32.totalorder %v1263_v61, 4  ;;  %v360_v47 = vsel %vm356_vm7, %v340_v29, %v343_v39  ;;  %v364_v2 = vsel %vm356_vm7, %v343_v39, %v346_v41  ;;  %v368_v6 = vsel %vm356_vm7, %v346_v41, %v349_v58 }
  0x76   : > { %v279_v46 = vsel %vm277_vm9, %v278_v60, %v1289_v38  ;;  %v361_v3 = vsel %vm359_vm11, %v349_v58, 2102212464  ;;  %v365_v4 = vsel %vm359_vm11, %v352_v62, 920167782  ;;  %v369_v10 = vsel %vm359_vm11, %v355_v63, 1326507024 }
  0x77   : > { %v280_v7 = vadd.s32 %v279_v46, %v275_v56  ;;  %v362_v8 = vsel %vm358_vm10, %v346_v41, %v361_v3  ;;  %v366_v9 = vsel %vm358_vm10, %v349_v58, %v365_v4  ;;  %v370_v13 = vsel %vm358_vm10, %v352_v62, %v369_v10 }
  0x78   : > { %v363_v11 = vsel %vm357_vm8, %v360_v47, %v362_v8  ;;  %v367_v12 = vsel %vm357_vm8, %v364_v2, %v366_v9  ;;  %v440_v14 = vsel %vm439_vm6, %v1256_v49, 0  ;;  %v371_v16 = vsel %vm357_vm8, %v368_v6, %v370_v13 }
  0x79   : > { %v281_v15 = vadd.s32 536870912, %v280_v7  ;;  %v1317_v17 = vmul.u32.u64.low %v1254_v48, %v367_v12  ;;  %v1318_v22 = vmul.u32.u64.high %v1254_v48, %v367_v12, %v1317_v17  ;;  %v442_v27 = vand.u32 31, %v440_v14 }
  0x7a   : > { %v1322_v24 = vmul.u32.u64.low %v1254_v48, %v371_v16  ;;  %v1323_v25 = vmul.u32.u64.high %v1254_v48, %v371_v16, %v1322_v24  ;;  %v1329_v28 = vadd.f32 %v1248_v40, %v1250_v42  ;;  %v379_v49 = vmul.u32 %v1254_v48, %v363_v11 }
  0x7b   : > { %v1325_v26 = vshrl.u32 %v281_v15, 30  ;;  %v428_v61 = vand.u32 2147483647, %v1236_v20  ;;  %v382_v29 = vadd.s32 1, %v1318_v22  ;;  %v443_v30 = vsub.s32 32, %v442_v27 }
  0x7c   : > { %vm381_vm12 = vc.u32 %v1323_v25, %v1317_v17  ;;  %v441_v40 = vshrl.u32 %v440_v14, 5  ;;  %v535_v42 = vand.u32 2139095040, %v1329_v28  ;;  %v445_v48 = vshll.u32 %v1071_v51, %v442_v27 }
  0x7d   : > { %v283_v31 = vshll.u32 %v1325_v26, 30  ;;  %v383_v32 = vsel %vm381_vm12, %v382_v29, %v1318_v22  ;;  %v435_v34 = vand.u32 8388607, %v428_v61  ;;  %v446_v35 = vshrl.u32 %v1072_v53, %v443_v30 }
  0x7e   : > { %v384_v33 = vadd.s32 %v383_v32, %v379_v49  ;;  %v448_v38 = vshll.u32 %v1072_v53, %v442_v27  ;;  %v449_v39 = vshrl.u32 %v1073_v55, %v443_v30  ;;  %v451_v44 = vshll.u32 %v1073_v55, %v442_v27 }
  0x7f   : > { %v452_v45 = vshrl.u32 %v1074_v57, %v443_v30  ;;  %v454_v43 = vshll.u32 %v1074_v57, %v442_v27  ;;  %v1348_v50 = vsub.s32 %v280_v7, %v283_v31  ;;  %v455_v52 = vshrl.u32 %v1075_v59, %v443_v30 }
  0x80   : > { %v385_v41 = vadd.s32 536870912, %v384_v33  ;;  %v457_v56 = vshll.u32 %v1075_v59, %v442_v27  ;;  %v458_v58 = vshrl.u32 %v1076_v5, %v443_v30  ;;  %v436_v60 = vor.u32 8388608, %v435_v34 }
  0x81   : > { %v447_v62 = vor.u32 %v446_v35, %v445_v48  ;;  %vm463_vm13 = vcmp.lt.s32.totalorder %v441_v40, 4  ;;  %v536_v63 = vshrl.u32 %v535_v42, 23  ;;  %v450_v2 = vor.u32 %v449_v39, %v448_v38 }
  0x82   : > { %v1351_v54 = vshrl.u32 %v385_v41, 30  ;;  %v453_v46 = vor.u32 %v452_v45, %v451_v44  ;;  %v456_v3 = vor.u32 %v455_v52, %v454_v43  ;;  %v286_v4 = vsub.s32 0, %v1348_v50 }
  0x83   : > { %v459_v6 = vor.u32 %v458_v58, %v457_v56  ;;  %vm460_vm14 = vcmp.lt.s32.totalorder %v441_v40, 1  ;;  %vm462_vm15 = vcmp.lt.s32.totalorder %v441_v40, 3  ;;  %v444_v8 = vshrl.u32 %v1071_v51, %v443_v30 }
  0x84   : > { %v387_v47 = vshll.u32 %v1351_v54, 30  ;;  %v469_v9 = vsel %vm463_vm13, %v456_v3, 920167782  ;;  %vm461_vm0 = vcmp.lt.s32.totalorder %v441_v40, 2  ;;  %v465_v10 = vsel %vm463_vm13, %v453_v46, 2102212464 }
  0x85   : > { %v799_v11 = vadd.s32 4294967169, %v536_v63  ;;  %v468_v13 = vsel %vm460_vm14, %v447_v62, %v450_v2  ;;  %v470_v14 = vsel %vm462_vm15, %v453_v46, %v469_v9  ;;  %v472_v15 = vsel %vm460_vm14, %v450_v2, %v453_v46 }
  0x86   : > { %v1357_v7 = vsub.s32 %v384_v33, %v387_v47  ;;  %v788_v16 = vmin.u32 %v286_v4, %v1348_v50  ;;  %v473_v22 = vsel %vm463_vm13, %v459_v6, 1326507024  ;;  %v476_v24 = vshll.u32 %v436_v60, 8 }
  0x87   : > { %v464_v49 = vsel %vm460_vm14, %v444_v8, %v447_v62  ;;  %v474_v29 = vsel %vm462_vm15, %v456_v3, %v473_v22  ;;  %v466_v30 = vsel %vm462_vm15, %v450_v2, %v465_v10  ;;  %v471_v31 = vsel %vm461_vm0, %v468_v13, %v470_v14 }
  0x88   : > { %v390_v12 = vsub.s32 0, %v1357_v7  ;;  %v475_v32 = vsel %vm461_vm0, %v472_v15, %v474_v29  ;;  %v542_v33 = vadd.s32 1, %v799_v11  ;;  %v288_v34 = vclz %v788_v16 }
  0x89   : > { %v1374_v48 = vmul.u32.u64.low %v476_v24, %v475_v32  ;;  %v1375_v35 = vmul.u32.u64.high %v476_v24, %v475_v32, %v1374_v48  ;;  %v467_v38 = vsel %vm461_vm0, %v464_v49, %v466_v30  ;;  %v532_v45 = vand.u32 2147483647, %v1329_v28 }
  0x8a   : > { %v792_v27 = vmin.u32 %v390_v12, %v1357_v7  ;;  %v1378_v39 = vmul.u32.u64.low %v476_v24, %v471_v31  ;;  %v1379_v41 = vmul.u32.u64.high %v476_v24, %v471_v31, %v1378_v39  ;;  %vm543_vm1 = vcmp.gt.s32.totalorder %v542_v33, 0 }
  0x8b   : > { %v544_v44 = vsel %vm543_vm1, %v542_v33, 0  ;;  %v789_v52 = vadd.s32 4294967294, %v288_v34  ;;  %v483_v58 = vmul.u32 %v476_v24, %v467_v38  ;;  %v539_v63 = vand.u32 8388607, %v532_v45 }
  0x8c   : > { %v392_v42 = vclz %v792_v27  ;;  %v546_v43 = vand.u32 31, %v544_v44  ;;  %vm485_vm2 = vc.u32 %v1375_v35, %v1378_v39  ;;  %v486_v60 = vadd.s32 1, %v1379_v41 }
  0x8d   : > { %vm790_vm3 = vcmp.lt.s32.totalorder %v789_v52, 0  ;;  %v545_v8 = vshrl.u32 %v544_v44, 5  ;;  %v540_v10 = vor.u32 8388608, %v539_v63  ;;  %v276_v49 = vadd.s32 %v1288_v37, %v1285_v36 }
  0x8e   : > { %v793_v56 = vadd.s32 4294967294, %v392_v42  ;;  %v547_v62 = vsub.s32 32, %v546_v43  ;;  %v487_v40 = vsel %vm485_vm2, %v486_v60, %v1379_v41  ;;  %v549_v2 = vshll.u32 %v1071_v51, %v546_v43 }
  0x8f   : > { %v488_v47 = vadd.s32 %v487_v40, %v483_v58  ;;  %v552_v3 = vshll.u32 %v1072_v53, %v546_v43  ;;  %v558_v9 = vshll.u32 %v1074_v57, %v546_v43  ;;  %v555_v11 = vshll.u32 %v1073_v55, %v546_v43 }
  0x90   : > { %vm794_vm4 = vcmp.lt.s32.totalorder %v793_v56, 0  ;;  %v550_v46 = vshrl.u32 %v1072_v53, %v547_v62  ;;  %v553_v4 = vshrl.u32 %v1073_v55, %v547_v62  ;;  %v556_v12 = vshrl.u32 %v1074_v57, %v547_v62 }
  0x91   : > { %v489_v6 = vadd.s32 536870912, %v488_v47  ;;  %v291_v13 = vsel %vm790_vm3, 0, %v789_v52  ;;  %v395_v14 = vsel %vm794_vm4, 0, %v793_v56  ;;  %v559_v16 = vshrl.u32 %v1075_v59, %v547_v62 }
  0x92   : > { %v551_v22 = vor.u32 %v550_v46, %v549_v2  ;;  %v554_v24 = vor.u32 %v553_v4, %v552_v3  ;;  %v561_v53 = vshll.u32 %v1075_v59, %v546_v43  ;;  %v562_v27 = vshrl.u32 %v1076_v5, %v547_v62 }
  0x93   : > { %v1396_v15 = vshrl.u32 %v489_v6, 30  ;;  %v560_v55 = vor.u32 %v559_v16, %v558_v9  ;;  %vm564_vm5 = vcmp.lt.s32.totalorder %v545_v8, 1  ;;  %v296_v57 = vsub.s32 4294967266, %v291_v13 }
  0x94   : > { %v400_v30 = vsub.s32 4294967266, %v395_v14  ;;  %v557_v31 = vor.u32 %v556_v12, %v555_v11  ;;  %v580_v32 = vshll.u32 %v540_v10, 8  ;;  %v548_v34 = vshrl.u32 %v1071_v51, %v547_v62 }
  0x95   : > { %v491_v29 = vshll.u32 %v1396_v15, 30  ;;  %vm566_vm6 = vcmp.lt.s32.totalorder %v545_v8, 3  ;;  %vm567_vm7 = vcmp.lt.s32.totalorder %v545_v8, 4  ;;  %v563_v42 = vor.u32 %v562_v27, %v561_v53 }
  0x96   : > { %vm565_vm8 = vcmp.lt.s32.totalorder %v545_v8, 2  ;;  %v569_v59 = vsel %vm567_vm7, %v557_v31, 2102212464  ;;  %v572_v5 = vsel %vm564_vm5, %v551_v22, %v554_v24  ;;  %v292_v36 = vsub.s32 32, %v291_v13 }
  0x97   : > { %v492_v33 = vsub.s32 %v488_v47, %v491_v29  ;;  %v380_v37 = vadd.s32 %v1317_v17, %v1323_v25  ;;  %v573_v38 = vsel %vm567_vm7, %v560_v55, 920167782  ;;  %v297_v41 = vadd.s32 127, %v296_v57 }
  0x98   : > { %v396_v44 = vsub.s32 32, %v395_v14  ;;  %v401_v43 = vadd.s32 127, %v400_v30  ;;  %v574_v51 = vsel %vm566_vm6, %v557_v31, %v573_v38  ;;  %v568_v56 = vsel %vm564_vm5, %v548_v34, %v551_v22 }
  0x99   : > { %v494_v48 = vsub.s32 0, %v492_v33  ;;  %v570_v58 = vsel %vm566_vm6, %v554_v24, %v569_v59  ;;  %v575_v60 = vsel %vm565_vm8, %v572_v5, %v574_v51  ;;  %v576_v62 = vsel %vm564_vm5, %v554_v24, %v557_v31 }
  0x9a   : > { %v577_v40 = vsel %vm567_vm7, %v563_v42, 1326507024  ;;  %v1416_v17 = vmul.u32.u64.low %v580_v32, %v575_v60  ;;  %v1417_v25 = vmul.u32.u64.high %v580_v32, %v575_v60, %v1416_v17  ;;  %v293_v47 = vshll.u32 %v1348_v50, %v291_v13 }
  0x9b   : > { %v796_v52 = vmin.u32 %v494_v48, %v492_v33  ;;  %v294_v2 = vshrl.u32 %v276_v49, %v292_v36  ;;  %v298_v46 = vshll.u32 %v297_v41, 23  ;;  %v578_v3 = vsel %vm566_vm6, %v560_v55, %v577_v40 }
  0x9c   : > { %v397_v4 = vshll.u32 %v1357_v7, %v395_v14  ;;  %v571_v9 = vsel %vm565_vm8, %v568_v56, %v570_v58  ;;  %v579_v10 = vsel %vm565_vm8, %v576_v62, %v578_v3  ;;  %v398_v11 = vshrl.u32 %v380_v37, %v396_v44 }
  0x9d   : > { %v496_v63 = vclz %v796_v52  ;;  %v402_v12 = vshll.u32 %v401_v43, 23  ;;  %v1425_v16 = vmul.u32.u64.low %v580_v32, %v579_v10  ;;  %v1426_v22 = vmul.u32.u64.high %v580_v32, %v579_v10, %v1425_v16 }
  0x9e   : > { %v484_v24 = vadd.s32 %v1378_v39, %v1375_v35  ;;  %v590_v50 = vadd.s32 1, %v1417_v25  ;;  %v295_v13 = vor.u32 %v294_v2, %v293_v47  ;;  %v299_v53 = vor.u32 4788187, %v298_v46 }
  0x9f   : > { %v797_v6 = vadd.s32 4294967294, %v496_v63  ;;  %v587_v7 = vmul.u32 %v580_v32, %v571_v9  ;;  %v399_v29 = vor.u32 %v398_v11, %v397_v4  ;;  %v403_v8 = vor.u32 4788187, %v402_v12 }
  0xa0   : > { %vm589_vm10 = vc.u32 %v1426_v22, %v1416_v17  ;;  %v300_v35 = vand.u32 2147483647, %v299_v53  ;;  %v302_v39 = vcvt.s32.f32 %v295_v13  ;;  %vm222_vm11 = vcmp.lt.s32.totalorder %v1232_v18, 0 }
  0xa1   : > { %vm798_vm9 = vcmp.lt.s32.totalorder %v797_v6, 0  ;;  %v591_v31 = vsel %vm589_vm10, %v590_v50, %v1417_v25  ;;  %v404_v59 = vand.u32 2147483647, %v403_v8  ;;  %v406_v5 = vcvt.s32.f32 %v399_v29 }
  0xa2   : > { %v499_v27 = vsel %vm798_vm9, 0, %v797_v6  ;;  %v592_v34 = vadd.s32 %v591_v31, %v587_v7  ;;  %v303_v48 = vmul.f32 %v302_v39, %v300_v35  ;;  %vm326_vm12 = vcmp.lt.s32.totalorder %v1234_v19, 0 }
  0xa3   : > { %v500_v14 = vsub.s32 32, %v499_v27  ;;  %v504_v49 = vsub.s32 4294967266, %v499_v27  ;;  %v501_v55 = vshll.u32 %v492_v33, %v499_v27  ;;  %v407_v33 = vmul.f32 %v406_v5, %v404_v59 }
  0xa4   : > { %v593_v32 = vadd.s32 536870912, %v592_v34  ;;  %v304_v51 = vxor.u32 2147483648, %v303_v48  ;;  %vm1441_vm13 = vcmp.le.f32.partialorder %v220_v21, 0.7853982  ;;  %vm1449_vm14 = vcmp.le.f32.partialorder %v324_v23, 0.7853982 }
  0xa5   : > { %v502_v57 = vshrl.u32 %v484_v24, %v500_v14  ;;  %v505_v30 = vadd.s32 127, %v504_v49  ;;  %v408_v56 = vxor.u32 2147483648, %v407_v33  ;;  %v306_v21 = vsub.s32 4, %v1325_v26 }
  0xa6   : > { %v1434_v38 = vshrl.u32 %v593_v32, 30  ;;  %v305_v40 = vsel %vm222_vm11, %v304_v51, %v303_v48  ;;  %v410_v4 = vsub.s32 4, %v1351_v54  ;;  %vm430_vm15 = vcmp.lt.s32.totalorder %v1236_v20, 0 }
  0xa7   : > { %v506_v42 = vshll.u32 %v505_v30, 23  ;;  %v503_v36 = vor.u32 %v502_v57, %v501_v55  ;;  %v409_v47 = vsel %vm326_vm12, %v408_v56, %v407_v33  ;;  %v308_v3 = vsel %vm1441_vm13, %v1232_v18, %v305_v40 }
  0xa8   : > { %v595_v43 = vshll.u32 %v1434_v38, 30  ;;  %v412_v23 = vsel %vm1449_vm14, %v1234_v19, %v409_v47  ;;  %vm1466_vm0 = vcmp.le.f32.partialorder %v428_v61, 0.7853982  ;;  %909 = vcosq.f32 %v308_v3 }
  0xa9   : > { %v507_v37 = vor.u32 4788187, %v506_v42  ;;  %v510_v44 = vcvt.s32.f32 %v503_v36  ;;  %v588_v11 = vadd.s32 %v1416_v17, %v1426_v22  ;;  %v307_v12 = vsel %vm222_vm11, %v306_v21, %v1325_v26 }
  0xaa   : > { %v596_v52 = vsub.s32 %v592_v34, %v595_v43  ;;  %911 = vsinq.f32 %v308_v3  ;;  %v411_v61 = vsel %vm326_vm12, %v410_v4, %v1351_v54  ;;  %v514_v53 = vsub.s32 4, %v1396_v15 }
  0xab   : > { %v508_v41 = vand.u32 2147483647, %v507_v37  ;;  %913 = vcosq.f32 %v412_v23  ;;  %v309_v26 = vsel %vm1441_vm13, 0, %v307_v12  ;;  %v413_v54 = vsel %vm1449_vm14, 0, %v411_v61 }
  0xac   : > { %v598_v60 = vsub.s32 0, %v596_v52  ;;  %915 = vsinq.f32 %v412_v23  ;;  %v313_v49 = vadd.s32 3, %v309_v26  ;;  %v515_v29 = vsel %vm430_vm15, %v514_v53, %v1396_v15 }
  0xad   : > { %v511_v58 = vmul.f32 %v510_v44, %v508_v41  ;;  %v417_v8 = vadd.s32 3, %v413_v54  ;;  %v517_v31 = vsel %vm1466_vm0, 0, %v515_v29  ;;  %v618_v39 = vsub.s32 4, %v1434_v38 }
  0xae   : > { %v800_v25 = vmin.u32 %v598_v60, %v596_v52  ;;  %v314_v42 = vand.u32 3, %v313_v49  ;;  %v521_v37 = vadd.s32 3, %v517_v31  ;;  %vm534_vm2 = vcmp.lt.s32.totalorder %v1329_v28, 0 }
  0xaf   : > { %v512_v2 = vxor.u32 2147483648, %v511_v58  ;;  %v418_v5 = vand.u32 3, %v417_v8  ;;  %vm1497_vm3 = vcmp.le.f32.partialorder %v532_v45, 0.7853982  ;;  %v619_v33 = vsel %vm534_vm2, %v618_v39, %v1434_v38 }
  0xb0   : > { %v600_v46 = vclz %v800_v25  ;;  %vm316_vm4 = vcmp.eq.s32.totalorder %v314_v42, 0  ;;  %vm319_vm5 = vcmp.eq.s32.totalorder %v314_v42, 2  ;;  %v522_v60 = vand.u32 3, %v521_v37 }
  0xb1   : > { %v513_v10 = vsel %vm430_vm15, %v512_v2, %v511_v58  ;;  %vm423_vm6 = vcmp.eq.s32.totalorder %v418_v5, 2  ;;  %vm420_vm7 = vcmp.eq.s32.totalorder %v418_v5, 0  ;;  %v621_v62 = vsel %vm1497_vm3, 0, %v619_v33 }
  0xb2   : > { %v801_v6 = vadd.s32 4294967294, %v600_v46  ;;  %v516_v17 = vsel %vm1466_vm0, %v1236_v20, %v513_v10  ;;  %v910_v30 = vpop.eup %909  ;;  %vm315_vm8 = vcmp.lt.s32.totalorder %v314_v42, 2  ;;  %vm419_vm9 = vcmp.lt.s32.totalorder %v418_v5, 2 }
  0xb3   : > { %917 = vcosq.f32 %v516_v17  ;;  %v320_v44 = vxor.u32 2147483648, %v910_v30  ;;  %v625_v46 = vadd.s32 3, %v621_v62  ;;  %vm524_vm10 = vcmp.eq.s32.totalorder %v522_v60, 0 }
  0xb4   : > { %vm802_vm1 = vcmp.lt.s32.totalorder %v801_v6, 0  ;;  %919 = vsinq.f32 %v516_v17  ;;  %v912_v34 = vpop.eup %911  ;;  %vm527_vm11 = vcmp.eq.s32.totalorder %v522_v60, 2  ;;  %vm312_vm12 = vweird.f32 %v1232_v18 }
  0xb5   : > { %v603_v16 = vsel %vm802_vm1, 0, %v801_v6  ;;  %v914_v59 = vpop.eup %913  ;;  %v317_v41 = vxor.u32 2147483648, %v912_v34  ;;  %v321_v40 = vsel %vm319_vm5, %v320_v44, %v912_v34  ;;  %vm416_vm13 = vweird.f32 %v1234_v19 }
  0xb6   : > { %v604_v24 = vsub.s32 32, %v603_v16  ;;  %v605_v50 = vshll.u32 %v596_v52, %v603_v16  ;;  %v608_v13 = vsub.s32 4294967266, %v603_v16  ;;  %v916_v32 = vpop.eup %915  ;;  %v424_v43 = vxor.u32 2147483648, %v914_v59 }
  0xb7   : > { %v421_v52 = vxor.u32 2147483648, %v916_v32  ;;  %v318_v38 = vsel %vm316_vm4, %v910_v30, %v317_v41  ;;  %vm523_vm14 = vcmp.lt.s32.totalorder %v522_v60, 2  ;;  %v626_v23 = vand.u32 3, %v625_v46 }
  0xb8   : > { %v606_v22 = vshrl.u32 %v588_v11, %v604_v24  ;;  %v609_v27 = vadd.s32 127, %v608_v13  ;;  %v425_v25 = vsel %vm423_vm6, %v424_v43, %v916_v32  ;;  %v322_v21 = vsel %vm315_vm8, %v318_v38, %v321_v40 }
  0xb9   : > { %v422_v63 = vsel %vm420_vm7, %v914_v59, %v421_v52  ;;  %v323_v9 = vsel %vm312_vm12, nan, %v322_v21  ;;  %v1077_v10 = vmov 1966171168   ;;  %vm520_vm15 = vweird.f32 %v1236_v20 }
  0xba   : > { %v607_v7 = vor.u32 %v606_v22, %v605_v50  ;;  %v610_v14 = vshll.u32 %v609_v27, 23  ;;  %v426_v3 = vsel %vm419_vm9, %v422_v63, %v425_v25  ;;  %v647_v11 = vunpack.c.l.s4 %v1077_v10 }
  0xbb   : > { %v427_v12 = vsel %vm416_vm13, nan, %v426_v3  ;;  %vm631_vm0 = vcmp.eq.s32.totalorder %v626_v23, 2  ;;  %v636_v24 = vmul.f32 5.656854, %v323_v9  ;;  %vm628_vm1 = vcmp.eq.s32.totalorder %v626_v23, 0 }
  0xbc   : > { %v611_v55 = vor.u32 4788187, %v610_v14  ;;  %v614_v57 = vcvt.s32.f32 %v607_v7  ;;  %v637_v19 = vmul.f32 5.656854, %v427_v12  ;;  %v648_v13 = vunpack.c.0.s8 %v647_v11 }
  0xbd   : > { %v918_v51 = vpop.eup %917  ;;  %vm671_vm4 = vcmp.lt.s32.totalorder %v162_v0, 512  ;;  %vm678_vm5 = vcmp.lt.s32.totalorder %v162_v0, 32 }
  0xbe   : > { %v612_v35 = vand.u32 2147483647, %v611_v55  ;;  %v920_v58 = vpop.eup %919  ;;  %v528_v2 = vxor.u32 2147483648, %v918_v51  ;;  %v644_v54 = vcombine.low %v636_v24, %v637_v19  ;;  %v651_v7 = vsub.s32 %v648_v13, %v1226_v1 }
  0xbf   : > { %v525_v47 = vxor.u32 2147483648, %v920_v58  ;;  %v1078_v1 = vmov 0.0  }
  0xc0   : > { %v615_v36 = vmul.f32 %v614_v57, %v612_v35  ;;  %v529_v6 = vsel %vm527_vm11, %v528_v2, %v920_v58  ;;  %v652_v8 = vrot.slane %v644_v54, %v651_v7 }
  0xc1   : > { %v526_v4 = vsel %vm524_vm10, %v918_v51, %v525_v47 }
  0xc2   : > { %v616_v48 = vxor.u32 2147483648, %v615_v36  ;;  %v530_v61 = vsel %vm523_vm14, %v526_v4, %v529_v6 }
  0xc3   : > { %v531_v53 = vsel %vm520_vm15, nan, %v530_v61 }
  0xc4   : > { %v617_v56 = vsel %vm534_vm2, %v616_v48, %v615_v36  ;;  %vm627_vm2 = vcmp.lt.s32.totalorder %v626_v23, 2  ;;  %v638_v20 = vmul.f32 5.656854, %v531_v53 }
  0xc5   : > { %v620_v45 = vsel %vm1497_vm3, %v1329_v28, %v617_v56  ;;  %vm624_vm3 = vweird.f32 %v1329_v28 }
  0xc6   : > { %921 = vcosq.f32 %v620_v45 }
  0xc7   : > { %923 = vsinq.f32 %v620_v45 }
  0xd0   : > { %v922_v16 = vpop.eup %921 }
  0xd1   : > { %v924_v18 = vpop.eup %923  ;;  %v632_v50 = vxor.u32 2147483648, %v922_v16 }
  0xd2   : > { %v629_v17 = vxor.u32 2147483648, %v924_v18 }
  0xd3   : > { %v633_v26 = vsel %vm631_vm0, %v632_v50, %v924_v18 }
  0xd4   : > { %v630_v22 = vsel %vm628_vm1, %v922_v16, %v629_v17 }
  0xd5   : > { %v634_v27 = vsel %vm627_vm2, %v630_v22, %v633_v26 }
  0xd6   : > { %v635_v14 = vsel %vm624_vm3, nan, %v634_v27 }
  0xd7   : > { %v639_v49 = vmul.f32 5.656854, %v635_v14 }
  0xd9   : > { %v645_v29 = vcombine.low %v638_v20, %v639_v49 }
  0xdb   : > { %v659_v55 = vrot.slane %v645_v29, %v651_v7 }
  0xdd   : > { %v660_v57 = vcombine.low %v652_v8, %v659_v55 }
  0xdf   : > { %v667_v28 = vrot.slane %v660_v57, %v651_v7 }
  0xe1   : > { %673 = vst.msk [vmem:[%s161_s29] sm:$0xf] %vm671_vm4, %v667_v28 }
  0xe2   : > { %680 = vst.msk [vmem:[%s161_s29] sm:$0x1] %vm678_vm5, %v1078_v1 }
  0xe3   : > { %994 = shalt.err (!%p991_p5)
}
  0xe4   : > { %s995_s3 = scalar_lea.hbm %s1520_s18, 64  ;;  %s999_s26 = scalar_lea.hbm %s1569_s2, 128 }
  0xe5   : > { %p996_p6 = scmp.ne.s32.totalorder %s1520_s18, %s995_s3  ;;  %p1000_p12 = scmp.lt.u32.totalorder %s1520_s18, %s1569_s2 }
  0xe6   : > { %p1001_p0 = scmp.lt.u32.totalorder %s999_s26, %s995_s3  ;;  %p1003_p13 = scmp.lt.u32.totalorder %s995_s3, %s1520_s18 }
  0xe7   : > { %p997_p7 = pnand %p996_p6, %p1589_p1 }
  0xe8   : > { %p1002_p4 = por %p1001_p0, %p1000_p12 }
  0xe9   : > { %p998_p9 = pneg %p997_p7 }
  0xea   : > { %p1004_p8 = por %p1003_p13, %p1002_p4 }
  0xec   : > { %p1005_p10 = pnand %p1004_p8, %p998_p9 }
  0xee   : > { %1008 = shalt.err (!%p1005_p10)
}
  0xef   : > { %833 = dma.vmem_to_hbm [thread:$0]  (%p1589_p1), %s1522_s8, 64, %s1520_s18, %s682_s12  }
  0xf0 PF: > { %p850_p11 = scmp.ge.s32.totalorder %s1067_s14, 2  ;;  %s710_s23 = sand.u32 1, %s1047_s9  }
  0xf1   : > { %p1590_p2 = scmp.ne.s32.totalorder %s1575_s21, 0  ;;  %s711_s24 = scalar_lea.sflag [#allocation4], %s710_s23 }
  0xf3   : > { %p843_p3 = pnand %p850_p11, %p1590_p2 }
  0xf5   : > { %1042 = dma.done.wait (!%p843_p3), %s711_s24, 64  }
  0xf6   : > { %1044 = vsyncadd (!%p843_p3), %s711_s24, 4294967232  ;;  %s17_s14 = sadd.s32 1, %s1067_s14   ;;  %s1591_s9 = smov %s1051_s10 }
  0xf7   : > { %p14_p5 = scmp.ge.s32.totalorder %s17_s14, 4   ;;  %s1592_s10 = smov %s1055_s11 }
  0xf8   : > { %s1593_s11 = smov %s1148_s22  ;;  %s1594_s12 = smov %s1063_s13 }
  0xf9   : > { %s1595_s13 = smov %s1597_s17  ;;  %16 = sbr.rel (!%p14_p5) target bundleno = 6 (0x6), region = 73 }
 0x100   :  { %716 = vsyncpa [#allocation3], 1 }
 0x101   :  { %718 = vsyncpa [#allocation3 + $0x1], 1 }
 0x102   :  { %719 = vsyncpa [#allocation6], 1 }
 0x103   :  { %720 = vsyncpa [#allocation4], 1 }
 0x104   :  { %722 = vsyncpa [#allocation4 + $0x1], 1 }

</bundles_post_ra>
